<compile_context>
chip_gen: v7x
topology: tpu7x:2x2x1
jax: 0.10.0
libtpu: 0.0.40
codegen_flags: <defaults>
</compile_context>

<pallas_src>
import functools
import math

import jax
import jax.numpy as jnp
from jax import lax
from jax.experimental import pallas as pl
from jax.experimental.pallas import tpu as pltpu


# ---------------------------------------------------------------------------
# Kernels
# ---------------------------------------------------------------------------

def _flc_kernel(x_ref, w_ref, out_ref):
    """Frequency linear compression: (2T, 601) @ (601, 256) per batch element.

    flc_low / flc_high (both bias-free) and the concat are fused into a single
    matmul with the combined, pre-transposed weight.
    """
    x = x_ref[0].astype(jnp.float32)           # (2T, 601)
    w = w_ref[...].astype(jnp.float32)         # (601, 256), pre-transposed
    y = jnp.dot(x, w, preferred_element_type=jnp.float32)
    out_ref[0] = y.astype(out_ref.dtype)


def _conv_stage_kernel(*refs, taps, n_src, t_out, f_out):
    """Fused Conv2d (sum of per-tap matmuls) + BatchNorm(eval) + PReLU.

    refs = (x_src_0, [x_src_1,] w_taps, scale, shift, alpha, out)
      x_src_k : (1, T_in, F_pad, Cin)  channels-last padded input slab(s)
      w_taps  : (n_taps, Cin, Cout)    conv weight, one (Cin,Cout) matrix/tap
      scale   : (1, 1, Cout)           folded BN scale
      shift   : (1, 1, Cout)           folded BN shift (includes conv bias)
      alpha   : (1, 1, Cout)           PReLU slope
      out     : (1, t_out, f_out, Cout)
    taps[i] = (src_idx, dh, f_off) describes which slab / shifts tap i reads.
    """
    x_refs = refs[:n_src]
    w_ref, scale_ref, shift_ref, alpha_ref, out_ref = refs[n_src:]
    cin = w_ref.shape[1]
    cout = w_ref.shape[2]

    acc = jnp.zeros((t_out, f_out, cout), jnp.float32)
    for tap_idx, (src, dh, f_off) in enumerate(taps):
        slab = x_refs[src][0, dh:dh + t_out, f_off:f_off + f_out, :]
        slab = slab.astype(jnp.float32)                       # (T, F, Cin)
        w_tap = w_ref[tap_idx].astype(jnp.float32)            # (Cin, Cout)
        w_b = jnp.broadcast_to(w_tap, (t_out, cin, cout))     # batched over T
        acc = acc + lax.dot_general(
            slab, w_b,
            dimension_numbers=(((2,), (1,)), ((0,), (0,))),
            preferred_element_type=jnp.float32)

    # BatchNorm (inference-mode, conv bias folded into shift), then PReLU.
    # TODO(synk): training-mode BatchNorm (batch statistics) is not implemented.
    y = acc * scale_ref[...] + shift_ref[...]
    y = jnp.where(y >= 0, y, alpha_ref[...] * y)
    out_ref[0] = y.astype(out_ref.dtype)


# ---------------------------------------------------------------------------
# Wrappers
# ---------------------------------------------------------------------------

def _conv_stage(x_srcs, w_taps, scale, shift, alpha, taps, t_out, f_out):
    B = x_srcs[0].shape[0]
    cout = w_taps.shape[2]
    n_src = len(x_srcs)

    in_specs = []
    for s in x_srcs:
        in_specs.append(pl.BlockSpec((1,) + s.shape[1:],
                                     lambda b: (b, 0, 0, 0)))
    in_specs += [
        pl.BlockSpec(w_taps.shape, lambda b: (0, 0, 0)),
        pl.BlockSpec(scale.shape, lambda b: (0, 0, 0)),
        pl.BlockSpec(shift.shape, lambda b: (0, 0, 0)),
        pl.BlockSpec(alpha.shape, lambda b: (0, 0, 0)),
    ]

    kernel = functools.partial(_conv_stage_kernel, taps=tuple(taps),
                               n_src=n_src, t_out=t_out, f_out=f_out)
    return pl.pallas_call(
        kernel,
        out_shape=jax.ShapeDtypeStruct((B, t_out, f_out, cout), jnp.float32),
        grid=(B,),
        in_specs=in_specs,
        out_specs=pl.BlockSpec((1, t_out, f_out, cout),
                               lambda b: (b, 0, 0, 0)),
        compiler_params=pltpu.CompilerParams(
            dimension_semantics=("parallel",)),
    )(*x_srcs, w_taps, scale, shift, alpha)


def _prep_conv(w, b, bn_gamma, bn_beta, bn_mean, bn_var, prelu_a, eps=1e-8):
    """Host-side weight re-layout + BN/bias folding (no in-kernel transposes)."""
    cout, cin, kh, kw = w.shape
    w_taps = jnp.transpose(w, (2, 3, 1, 0)).reshape(kh * kw, cin, cout)
    scale = bn_gamma / jnp.sqrt(bn_var + eps)
    shift = bn_beta + (b - bn_mean) * scale
    return (w_taps,
            scale.reshape(1, 1, cout),
            shift.reshape(1, 1, cout),
            prelu_a.reshape(1, 1, cout))


def encoder_forward(x, params):
    """x: (B, 601, T, 2) as the PyTorch Encoder expects.

    Returns [x_1, ..., x_5] in PyTorch (B, C, T, F) layout.
    """
    B, F, T, _ = x.shape
    f32 = jnp.float32
    x = x.astype(f32)

    # permute(0, 3, 2, 1) -> (B, 2, T, 601); fold channel into rows for the FLC.
    xp = jnp.transpose(x, (0, 3, 2, 1)).reshape(B, 2 * T, F)

    w_flc_t = params["w_flc_t"]                 # (601, 256)
    flc = pl.pallas_call(
        _flc_kernel,
        out_shape=jax.ShapeDtypeStruct((B, 2 * T, 256), f32),
        grid=(B,),
        in_specs=[pl.BlockSpec((1, 2 * T, F), lambda b: (b, 0, 0)),
                  pl.BlockSpec(w_flc_t.shape, lambda b: (0, 0))],
        out_specs=pl.BlockSpec((1, 2 * T, 256), lambda b: (b, 0, 0)),
        compiler_params=pltpu.CompilerParams(
            dimension_semantics=("parallel",)),
    )(xp, w_flc_t)

    # channels-last (B, T, 256, 2)
    x0 = jnp.transpose(flc.reshape(B, 2, T, 256), (0, 2, 3, 1))

    F_OUT = 127      # true output frequency width of every conv stage
    F_PAD = 128      # lane-dense width computed by the kernels (col 127 = scratch)

    c = params["convs"]
    outs = []

    # --- stage 1: Conv2d(2,16,(2,5),stride=(1,2),pad=(1,1)), crop [:, :, :-1, :]
    w1, s1, sh1, a1 = _prep_conv(**c[0])
    xpad = jnp.pad(x0, ((0, 0), (1, 1), (1, 3), (0, 0)))     # (B, T+2, 260, 2)
    x_even = xpad[:, :, 0::2, :]                             # (B, T+2, 130, 2)
    x_odd = xpad[:, :, 1::2, :]                              # (B, T+2, 130, 2)
    taps1 = [(dw % 2, dh, dw // 2) for dh in range(2) for dw in range(5)]
    y = _conv_stage([x_even, x_odd], w1, s1, sh1, a1, taps1, T, F_PAD)
    outs.append(y)

    # --- stages 2-4: Conv2d(.., (2,3), stride 1, pad (1,1)), crop [:, :, :-1, :]
    for idx in (1, 2, 3):
        wi, si, shi, ai = _prep_conv(**c[idx])
        xin = jnp.pad(y[:, :, :F_OUT, :],
                      ((0, 0), (1, 1), (1, 2), (0, 0)))      # (B, T+2, 130, Cin)
        taps = [(0, dh, dw) for dh in range(2) for dw in range(3)]
        y = _conv_stage([xin], wi, si, shi, ai, taps, T, F_PAD)
        outs.append(y)

    # --- stage 5: Conv2d(64,80,(1,2), stride 1, pad (0,1)), crop [:, :, :, :-1]
    w5, s5, sh5, a5 = _prep_conv(**c[4])
    xin = jnp.pad(y[:, :, :F_OUT, :],
                  ((0, 0), (0, 0), (1, 1), (0, 0)))          # (B, T, 129, 64)
    taps5 = [(0, 0, dw) for dw in range(2)]
    y5 = _conv_stage([xin], w5, s5, sh5, a5, taps5, T, F_PAD)
    outs.append(y5)

    # Crop the scratch frequency column, return PyTorch (B, C, T, F) layout.
    return [jnp.transpose(o[:, :, :F_OUT, :], (0, 3, 1, 2)) for o in outs]


# ---------------------------------------------------------------------------
# Parameters (PyTorch-default-style init)
# ---------------------------------------------------------------------------

def init_params(key):
    # TODO(synk): init_load() loads SpecCompress.npy for the FLC weights; no
    # file I/O allowed here, so FLC weights use the nn.Linear default init.
    F, F_c, F_low = 601, 256, 125
    channels = [2, 16, 32, 48, 64, 80]
    ksizes = [(2, 5), (2, 3), (2, 3), (2, 3), (1, 2)]
    keys = jax.random.split(key, 2 + 2 * len(ksizes))

    k_lin = 1.0 / math.sqrt(F)
    w_low = jax.random.uniform(keys[0], (F_low, F), jnp.float32, -k_lin, k_lin)
    w_high = jax.random.uniform(keys[1], (F_c - F_low, F), jnp.float32,
                                -k_lin, k_lin)
    params = {"w_flc_t": jnp.concatenate([w_low, w_high], axis=0).T}  # (601,256)

    convs = []
    for i, (kh, kw) in enumerate(ksizes):
        cin, cout = channels[i], channels[i + 1]
        bnd = 1.0 / math.sqrt(cin * kh * kw)
        w = jax.random.uniform(keys[2 + 2 * i], (cout, cin, kh, kw),
                               jnp.float32, -bnd, bnd)
        b = jax.random.uniform(keys[3 + 2 * i], (cout,), jnp.float32, -bnd, bnd)
        convs.append({
            "w": w, "b": b,
            "bn_gamma": jnp.ones((cout,), jnp.float32),
            "bn_beta": jnp.zeros((cout,), jnp.float32),
            "bn_mean": jnp.zeros((cout,), jnp.float32),
            "bn_var": jnp.ones((cout,), jnp.float32),
            "prelu_a": jnp.full((cout,), 0.25, jnp.float32),
        })
    params["convs"] = convs
    return params


if __name__ == "__main__":
    B, T = 2, 8
    key = jax.random.PRNGKey(0)
    kx, kp = jax.random.split(key)
    x = jax.random.normal(kx, (B, 601, T, 2), jnp.float32)
    params = init_params(kp)

    outs = encoder_forward(x, params)
    for o in outs:
        o.block_until_ready()

    expected = [(B, 16, T, 127), (B, 32, T, 127), (B, 48, T, 127),
                (B, 64, T, 127), (B, 80, T, 127)]
    for o, e in zip(outs, expected):
        assert o.shape == e, (o.shape, e)
        assert bool(jnp.isfinite(o).all())
    print("KERNEL_OK")
</pallas_src>

<mosaic_0001>
module attributes {stable_mosaic.version = 11 : i64} {
  func.func @_flc_kernel(%arg0: i32, %arg1: memref<1x16x601xf32, #tpu.memory_space<vmem>>, %arg2: memref<601x256xf32, #tpu.memory_space<vmem>>, %arg3: memref<1x16x256xf32, #tpu.memory_space<vmem>>) attributes {dimension_semantics = [#tpu.dimension_semantics<parallel>], iteration_bounds = array<i64: 2>, scalar_prefetch = 0 : i64, scratch_operands = 0 : i64, tpu.core_type = #tpu.core_type<tc>, window_params = [{transform_indices = @transform_0, window_bounds = array<i64: 1, 16, 601>}, {pipeline_mode = #tpu.pipeline_mode<synchronous>, transform_indices = @transform_1, window_bounds = array<i64: 601, 256>}, {transform_indices = @transform_2, window_bounds = array<i64: 1, 16, 256>}]} {
    %c0 = arith.constant 0 : index
    %c0_0 = arith.constant 0 : index
    %c0_1 = arith.constant 0 : index
    %0 = vector.load %arg1[%c0, %c0_0, %c0_1] : memref<1x16x601xf32, #tpu.memory_space<vmem>>, vector<1x16x601xf32>
    %1 = vector.shape_cast %0 : vector<1x16x601xf32> to vector<16x601xf32>
    %c0_2 = arith.constant 0 : index
    %c0_3 = arith.constant 0 : index
    %2 = vector.load %arg2[%c0_2, %c0_3] : memref<601x256xf32, #tpu.memory_space<vmem>>, vector<601x256xf32>
    %cst = arith.constant dense<0.000000e+00> : vector<16x256xf32>
    %3 = tpu.matmul %1, %2, %cst {dimension_numbers = #tpu.dot_dimension_numbers<[1], [0], [0], [1], [0, 0, 1, 1], [], []>} : vector<16x601xf32>, vector<601x256xf32>, vector<16x256xf32> -> vector<16x256xf32>
    %c0_4 = arith.constant 0 : index
    %c0_5 = arith.constant 0 : index
    %c0_6 = arith.constant 0 : index
    %4 = vector.load %arg3[%c0_4, %c0_5, %c0_6] : memref<1x16x256xf32, #tpu.memory_space<vmem>>, vector<1x16x256xf32>
    %5 = vector.shape_cast %4 : vector<1x16x256xf32> to vector<16x256xf32>
    %6 = vector.shape_cast %3 : vector<16x256xf32> to vector<1x16x256xf32>
    tpu.vector_store %arg3[%c0_4, %c0_5, %c0_6], %6 {strides = array<i32>} : memref<1x16x256xf32, #tpu.memory_space<vmem>>, vector<1x16x256xf32>,
    return
  }
  func.func @transform_0(%arg0: i32) -> (i32, i32, i32) {
    %c0_i32 = arith.constant 0 : i32
    %c0_i32_0 = arith.constant 0 : i32
    %c0_i32_1 = arith.constant 0 : i32
    return %arg0, %c0_i32, %c0_i32_0 : i32, i32, i32
  }
  func.func @transform_1(%arg0: i32) -> (i32, i32) {
    %c0_i32 = arith.constant 0 : i32
    %c0_i32_0 = arith.constant 0 : i32
    %c0_i32_1 = arith.constant 0 : i32
    return %c0_i32, %c0_i32_0 : i32, i32
  }
  func.func @transform_2(%arg0: i32) -> (i32, i32, i32) {
    %c0_i32 = arith.constant 0 : i32
    %c0_i32_0 = arith.constant 0 : i32
    %c0_i32_1 = arith.constant 0 : i32
    return %arg0, %c0_i32, %c0_i32_0 : i32, i32, i32
  }
}

</mosaic_0001>

<bundles_post_ra>
// kernel: tpu_custom_call.1
= control target key start
LH: loop header
LB: loop body
LE: loop exit
PB: predicated region body
PF: predicated region fallthrough
CT: control target
= control target key end

     0   :  { %7 = vsyncpa [#allocation3], 0  ;;  %s1315_s0 = inlined_call_operand.hbm [shape: f32[2,16,601], index: 0, kind: input, shape index: {}]   ;;  %s1316_s1 = inlined_call_operand.hbm [shape: f32[601,256], index: 1, kind: input, shape index: {}]   ;;  %s1317_s2 = inlined_call_operand.hbm [shape: f32[2,16,256], index: 2, kind: output, shape index: {}]  }
   0x1   :  { %9 = vsyncpa [#allocation3 + $0x1], 0 }
   0x2   :  { %10 = vsyncpa [#allocation6], 0 }
   0x3   :  { %11 = vsyncpa [#allocation4], 0 }
   0x4   :  { %13 = vsyncpa [#allocation4 + $0x1], 0  ;;  %s1101_s9 = smov 0   ;;  %s1103_s10 = smov 0  }
   0x5   :  { %s1105_s11 = smov 0   ;;  %s1107_s12 = smov 0  }
   0x6 LB: > { %s1122_s13 = sadd.s32 4294967295, %s1073_s12   ;;  %s685_s14 = sadd.s32 4294967294, %s1073_s12   ;;  %s1073_s12 = sphi %s1107_s12, %s1337_s12   ;;  %s1069_s11 = sphi %s1105_s11, %s1336_s11   ;;  %s1065_s10 = sphi %s1103_s10, %s1335_s10   ;;  %s1061_s9 = sphi %s1101_s9, %s1334_s9  }
   0x7   : > { %p39_p0 = scmp.ne.s32.totalorder %s1065_s10, %s1061_s9  ;;  %p1318_p1 = scmp.eq.s32.totalorder %s1122_s13, 0 }
   0x8   : > { %p90_p3 = scmp.eq.s32.totalorder %s685_s14, 1  ;;  %p686_p5 = scmp.ge.s32.totalorder %s1073_s12, 1 }
   0x9   : > { %p1131_p4 = por %p1318_p1, %p39_p0  ;;  %p97_p7 = scmp.lt.s32.totalorder %s1073_s12, 3 }
   0xa   : > { %p1136_p6 = por %p90_p3, %p39_p0  ;;  %s1075_s18 = smov [#allocation5]  }
   0xb   : > { %s1321_s15 = scalar_select %p1131_p4, 1, 0 }
   0xc   : > { %s1322_s16 = scalar_select %p1136_p6, 1, 0 }
   0xd   : > { %p1141_p8 = pnand %p686_p5, %p97_p7  ;;  %s109_s19 = sshll.u32 %s1075_s18, 4  ;;  %s1145_s19 = int_to_ptr.vmem [resolvable:$true] %s109_s19 }
   0xe   : > { %s1157_s21 = sadd.s32 1, %s1073_s12   ;;  %s26_s22 = sadd.s32 1, %s1069_s11 }
   0xf   : > { %s1323_s17 = scalar_select %p1141_p8, 1, 0 }
  0x10   : > { %p888_p9 = pneg %p1141_p8  ;;  %s23_s23 = ssub.s32 %s1073_s12, %s1157_s21 }
  0x11   : > { %s945_s26 = scalar_lea.hbm %s1316_s1, 19456 }
  0x12   : > { %p1152_p11 = pnand %p888_p9, %p1318_p1  ;;  %p946_p12 = scmp.ne.s32.totalorder %s1316_s1, %s945_s26 }
  0x13   : > { %p952_p5 = scmp.lt.u32.totalorder %s945_s26, %s1316_s1 }
  0x14   : > { %p947_p13 = pneg %p1152_p11 }
  0x16   : > { %p948_p0 = pnand %p947_p13, %p946_p12 }
  0x18   : > { %p949_p3 = pneg %p948_p0 }
  0x1a   : > { %p954_p7 = pnand %p952_p5, %p949_p3 }
  0x1c   : > { %957 = shalt.err (!%p954_p7)
}
  0x1d   : > { %s958_s3 = scalar_lea.vmem %s1145_s19, 19456  ;;  %p966_p2 = scmp.lt.s32.totalorder %s1145_s19, %s1145_s19 }
  0x1e   : > { %p959_p9 = scmp.ne.s32.totalorder %s1145_s19, %s958_s3  ;;  %p967_p6 = scmp.lt.s32.totalorder %s958_s3, %s958_s3 }
  0x20   : > { %p961_p10 = pnand %p959_p9, %p947_p13  ;;  %p968_p4 = por %p967_p6, %p966_p2 }
  0x22   : > { %p962_p1 = pneg %p961_p10 }
  0x24   : > { %p969_p8 = pnand %p968_p4, %p962_p1 }
  0x26   : > { %972 = shalt.err (!%p969_p8)
}
  0x27   : > { %s1076_s4 = smov 256   ;;  %s1077_s5 = smov 16  }
  0x28   : > { %891 = dma.hbm_to_vmem [thread:$0]  (!%p1152_p11), %s1316_s1, 19456, %s1145_s19, [#allocation6], %s1076_s4, %s1076_s4, %s1077_s5  }
  0x29   : > { %p24_p2 = scmp.eq.s32.totalorder %s23_s23, 0  ;;  %p33_p1 = scmp.ne.s32.totalorder %s1069_s11, %s1065_s10 }
  0x2a   : > { %p34_p4 = scmp.eq.s32.totalorder %s1073_s12, 0  ;;  %p901_p6 = scmp.lt.s32.totalorder %s1073_s12, 2 }
  0x2b   : > { %s1188_s8 = scalar_select %p24_p2, %s1069_s11, %s26_s22  }
  0x2c   : > { %p35_p8 = por %p34_p4, %p33_p1  ;;  %p1325_p10 = scmp.eq.s32.totalorder %s1122_s13, 1 }
  0x2d   : > { %s123_s18 = sand.u32 1, %s1069_s11   ;;  %s878_s24 = smul.u32 1280, %s1073_s12 }
  0x2e   : > { %p1192_p12 = por %p1325_p10, %p33_p1  ;;  %s877_s25 = smul.u32 80, %s123_s18 }
  0x2f   : > { %s1201_s27 = scalar_lea.hbm %s1315_s0, %s878_s24  ;;  %p1203_p11 = pnand %p901_p6, %p35_p8 }
  0x30   : > { %s127_s22 = scalar_lea.vmem [#allocation2], %s877_s25  ;;  %s1209_s28 = scalar_lea.sflag [#allocation3], %s123_s18 }
  0x31   : > { %s134_s23 = sshll.u32 %s127_s22, 4  ;;  %s973_s29 = scalar_lea.hbm %s1201_s27, 1280  ;;  %s1207_s23 = int_to_ptr.vmem [resolvable:$true] %s134_s23 }
  0x32   : > { %p974_p13 = scmp.ne.s32.totalorder %s1201_s27, %s973_s29  ;;  %p975_p0 = pneg %p1203_p11 }
  0x33   : > { %s978_s4 = scalar_lea.hbm %s1315_s0, 2560  ;;  %p979_p7 = scmp.lt.u32.totalorder %s1201_s27, %s1315_s0 }
  0x34   : > { %p976_p3 = pnand %p975_p0, %p974_p13  ;;  %p980_p9 = scmp.lt.u32.totalorder %s978_s4, %s973_s29 }
  0x35   : > { %p982_p1 = scmp.lt.u32.totalorder %s973_s29, %s1201_s27 }
  0x36   : > { %p977_p5 = pneg %p976_p3  ;;  %p981_p2 = por %p980_p9, %p979_p7 }
  0x38   : > { %p983_p4 = por %p982_p1, %p981_p2 }
  0x3a   : > { %p984_p6 = pnand %p983_p4, %p977_p5 }
  0x3c   : > { %987 = shalt.err (!%p984_p6)
}
  0x3d   : > { %s988_s7 = scalar_lea.vmem %s1207_s23, 1280  ;;  %s1078_s18 = smov [#allocation2]  }
  0x3e   : > { %p989_p8 = scmp.ne.s32.totalorder %s1207_s23, %s988_s7  ;;  %s993_s24 = sshll.u32 %s1078_s18, 4  ;;  %s994_s24 = int_to_ptr.vmem [resolvable:$false] %s993_s24 }
  0x3f   : > { %s995_s25 = scalar_lea.vmem %s994_s24, 2560  ;;  %p996_p3 = scmp.lt.s32.totalorder %s1207_s23, %s994_s24 }
  0x40   : > { %p991_p10 = pnand %p989_p8, %p975_p0  ;;  %p997_p7 = scmp.lt.s32.totalorder %s995_s25, %s988_s7 }
  0x42   : > { %p992_p13 = pneg %p991_p10  ;;  %p998_p9 = por %p997_p7, %p996_p3 }
  0x44   : > { %p999_p2 = pnand %p998_p9, %p992_p13 }
  0x46   : > { %1002 = shalt.err (!%p999_p2)
}
  0x47   : > { %s1079_s20 = smov 640   ;;  %s1080_s26 = smov 40  }
  0x48   : > { %895 = dma.hbm_to_vmem [thread:$0]  (!%p1203_p11), %s1201_s27, 1280, %s1207_s23, %s1209_s28, %s1079_s20, %s1079_s20, %s1080_s26  }
  0x49   : > { %p1328_p0 = scmp.ne.s32.totalorder %s1323_s17, 0 }
  0x4a   : > { %s1240_s22 = sand.u32 (!%p1328_p0), 1, %s1065_s10   ;;  %p1329_p5 = scmp.ne.s32.totalorder (!%p1328_p0), %s1321_s15, 0 }
  0x4b   : > { %146 = sbr.rel (%p1328_p0) target bundleno = 409 (0x199), region = 28  ;;  %s149_s30 = scalar_lea.sflag (!%p1328_p0), [#allocation3], %s1240_s22 }
  0x4c   : > { %s879_s29 = smul.u32 (!%p1328_p0), 80, %s1240_s22 }
  0x4e   : > { %s1244_s3 = scalar_lea.vmem (!%p1328_p0), [#allocation2], %s879_s29 }
  0x52   : > { %1048 = dma.done.wait (%p1329_p5), %s149_s30, 1280  }
  0x53   : > { %1050 = vsyncadd (%p1329_p5), %s149_s30, 4294966016  ;;  %p1330_p11 = scmp.eq.s32.totalorder %s1122_s13, 0 }
  0x55   : > { %1052 = dma.done.wait (%p1330_p11), [#allocation6], 19456   ;;  %p1331_p1 = pmov %p1330_p11 }
  0x56   : > { %v188_v0 = vld [vmem:[#allocation5 + $0x8] sm:$0xff]  ;;  %v190_v1 = vld [vmem:[#allocation5 + $0x18] sm:$0xff]  ;;  %v187_v5 = vld [vmem:[#allocation5] sm:$0xff]  ;;  %vm346_vm0 = vcmask 1040384   ;;  %vm1082_vm1 = vmmov 1   ;;  %vm339_vm3 = vcmask 728064  }
  0x57   : > { %1054 = vsyncadd (%p1331_p1), [#allocation6], 4294947840  ;;  %v252_v2 = vld [vmem:[#allocation5 + $0x208] sm:$0xff]  ;;  %v703_v3 = vpack.c.bf16 %v190_v1, %v188_v0  ;;  %v254_v4 = vld [vmem:[#allocation5 + $0x218] sm:$0xff]  ;;  %s692_s15 = sshll.u32 %s1240_s22, 5  ;;  %s702_s19 = sshll.u32 %s1122_s13, 9 }
  0x58   : > { %v189_v6 = vld [vmem:[#allocation5 + $0x10] sm:$0xff]  ;;  %v767_v7 = vpack.c.bf16 %v254_v4, %v252_v2  ;;  %v251_v9 = vld [vmem:[#allocation5 + $0x200] sm:$0xff]  ;;  %v192_v11 = vld [vmem:[#allocation5 + $0x28] sm:$0xff]  ;;  %s176_s17 = scalar_lea.vmem [#allocation7], %s692_s15  ;;  %s1271_s4 = scalar_lea.hbm %s1317_s2, %s702_s19 }
  0x59   : > { %v705_v8 = vpack.c.bf16 %v189_v6, %v187_v5  ;;  %v253_v10 = vld [vmem:[#allocation5 + $0x210] sm:$0xff]  ;;  %704 = vmatprep.subr.bf16.mxu1 %v703_v3  ;;  %v194_v13 = vld [vmem:[#allocation5 + $0x38] sm:$0xff]  ;;  %v256_v14 = vld [vmem:[#allocation5 + $0x228] sm:$0xff]  ;;  %s602_s27 = sshll.u32 %s176_s17, 4  ;;  %s589_s13 = scalar_lea.sflag [#allocation4], %s1240_s22  ;;  %s1266_s27 = int_to_ptr.vmem [resolvable:$true] %s602_s27 }
  0x5a   : > { %v769_v12 = vpack.c.bf16 %v253_v10, %v251_v9  ;;  %v258_v15 = vld [vmem:[#allocation5 + $0x238] sm:$0xff]  ;;  %768 = vmatprep.subr.bf16.mxu0 %v767_v7  ;;  %v707_v16 = vpack.c.bf16 %v194_v13, %v192_v11  ;;  %v191_v18 = vld [vmem:[#allocation5 + $0x20] sm:$0xff]  ;;  %v193_v19 = vld [vmem:[#allocation5 + $0x30] sm:$0xff]  ;;  %s1003_s5 = scalar_lea.vmem %s1266_s27, 512  ;;  %s1083_s6 = smov [#allocation7]  }
  0x5b   : > { %706 = vmatpush1.bf16.msra.mxu1 %v705_v8  ;;  %v771_v17 = vpack.c.bf16 %v258_v15, %v256_v14  ;;  %v255_v20 = vld [vmem:[#allocation5 + $0x220] sm:$0xff]  ;;  %v709_v21 = vpack.c.bf16 %v193_v19, %v191_v18  ;;  %v257_v22 = vld [vmem:[#allocation5 + $0x230] sm:$0xff]  ;;  %v196_v23 = vld [vmem:[#allocation5 + $0x48] sm:$0xff]  ;;  %p1004_p4 = scmp.ne.s32.totalorder %s1266_s27, %s1003_s5  ;;  %s1007_s7 = sshll.u32 %s1083_s6, 4  ;;  %s1008_s7 = int_to_ptr.vmem [resolvable:$false] %s1007_s7 }
  0x5c   : > { %770 = vmatpush1.bf16.msra.mxu0 %v769_v12  ;;  %v198_v24 = vld [vmem:[#allocation5 + $0x58] sm:$0xff]  ;;  %708 = vmatprep.subr.bf16.mxu1 %v707_v16  ;;  %v773_v25 = vpack.c.bf16 %v257_v22, %v255_v20  ;;  %v260_v27 = vld [vmem:[#allocation5 + $0x248] sm:$0xff]  ;;  %v195_v29 = vld [vmem:[#allocation5 + $0x40] sm:$0xff]  ;;  %s1009_s18 = scalar_lea.vmem %s1008_s7, 1024  ;;  %p1010_p10 = scmp.lt.s32.totalorder %s1266_s27, %s1008_s7 }
  0x5d   : > { %772 = vmatprep.subr.bf16.mxu0 %v771_v17  ;;  %v711_v26 = vpack.c.bf16 %v198_v24, %v196_v23  ;;  %v262_v28 = vld [vmem:[#allocation5 + $0x258] sm:$0xff]  ;;  %v197_v31 = vld [vmem:[#allocation5 + $0x50] sm:$0xff]  ;;  %v259_v32 = vld [vmem:[#allocation5 + $0x240] sm:$0xff]  ;;  %p1005_p6 = pnand %p1004_p4, %p1192_p12  ;;  %p1011_p13 = scmp.lt.s32.totalorder %s1009_s18, %s1003_s5 }
  0x5e   : > { %v775_v30 = vpack.c.bf16 %v262_v28, %v260_v27  ;;  %v261_v33 = vld [vmem:[#allocation5 + $0x250] sm:$0xff]  ;;  %v713_v34 = vpack.c.bf16 %v197_v31, %v195_v29  ;;  %v200_v35 = vld [vmem:[#allocation5 + $0x68] sm:$0xff]  ;;  %v202_v36 = vld [vmem:[#allocation5 + $0x78] sm:$0xff] }
  0x5f   : > { %710 = vmatpush1.bf16.msra.mxu1 %v709_v21  ;;  %v264_v37 = vld [vmem:[#allocation5 + $0x268] sm:$0xff]  ;;  %v777_v38 = vpack.c.bf16 %v261_v33, %v259_v32  ;;  %v715_v39 = vpack.c.bf16 %v202_v36, %v200_v35  ;;  %v266_v40 = vld [vmem:[#allocation5 + $0x278] sm:$0xff]  ;;  %v199_v41 = vld [vmem:[#allocation5 + $0x60] sm:$0xff]  ;;  %p1006_p8 = pneg %p1005_p6  ;;  %p1012_p3 = por %p1011_p13, %p1010_p10 }
  0x60   : > { %774 = vmatpush1.bf16.msra.mxu0 %v773_v25  ;;  %712 = vmatprep.subr.bf16.mxu1 %v711_v26  ;;  %v201_v42 = vld [vmem:[#allocation5 + $0x70] sm:$0xff]  ;;  %v779_v43 = vpack.c.bf16 %v266_v40, %v264_v37  ;;  %v263_v44 = vld [vmem:[#allocation5 + $0x260] sm:$0xff]  ;;  %v204_v46 = vld [vmem:[#allocation5 + $0x88] sm:$0xff] }
  0x61   : > { %776 = vmatprep.subr.bf16.mxu0 %v775_v30  ;;  %v265_v45 = vld [vmem:[#allocation5 + $0x270] sm:$0xff]  ;;  %v206_v47 = vld [vmem:[#allocation5 + $0x98] sm:$0xff]  ;;  %v268_v48 = vld [vmem:[#allocation5 + $0x288] sm:$0xff]  ;;  %v717_v50 = vpack.c.bf16 %v201_v42, %v199_v41  ;;  %p1013_p7 = pnand %p1012_p3, %p1006_p8 }
  0x62   : > { %v270_v49 = vld [vmem:[#allocation5 + $0x298] sm:$0xff]  ;;  %v781_v51 = vpack.c.bf16 %v265_v45, %v263_v44  ;;  %v719_v52 = vpack.c.bf16 %v206_v47, %v204_v46  ;;  %v203_v53 = vld [vmem:[#allocation5 + $0x80] sm:$0xff]  ;;  %v205_v54 = vld [vmem:[#allocation5 + $0x90] sm:$0xff] }
  0x63   : > { %714 = vmatpush1.bf16.msra.mxu1 %v713_v34  ;;  %v267_v55 = vld [vmem:[#allocation5 + $0x280] sm:$0xff]  ;;  %v783_v56 = vpack.c.bf16 %v270_v49, %v268_v48  ;;  %v269_v57 = vld [vmem:[#allocation5 + $0x290] sm:$0xff]  ;;  %v208_v58 = vld [vmem:[#allocation5 + $0xa8] sm:$0xff]  ;;  %v721_v62 = vpack.c.bf16 %v205_v54, %v203_v53 }
  0x64   : > { %778 = vmatpush1.bf16.msra.mxu0 %v777_v38  ;;  %716 = vmatprep.subr.bf16.mxu1 %v715_v39  ;;  %v210_v59 = vld [vmem:[#allocation5 + $0xb8] sm:$0xff]  ;;  %v272_v60 = vld [vmem:[#allocation5 + $0x2a8] sm:$0xff]  ;;  %v785_v63 = vpack.c.bf16 %v269_v57, %v267_v55  ;;  %v207_v1 = vld [vmem:[#allocation5 + $0xa0] sm:$0xff] }
  0x65   : > { %780 = vmatprep.subr.bf16.mxu0 %v779_v43  ;;  %v274_v61 = vld [vmem:[#allocation5 + $0x2b8] sm:$0xff]  ;;  %v723_v0 = vpack.c.bf16 %v210_v59, %v208_v58  ;;  %v209_v2 = vld [vmem:[#allocation5 + $0xb0] sm:$0xff]  ;;  %v271_v3 = vld [vmem:[#allocation5 + $0x2a0] sm:$0xff] }
  0x66   : > { %v787_v4 = vpack.c.bf16 %v274_v61, %v272_v60  ;;  %v273_v5 = vld [vmem:[#allocation5 + $0x2b0] sm:$0xff]  ;;  %v212_v6 = vld [vmem:[#allocation5 + $0xc8] sm:$0xff]  ;;  %v214_v7 = vld [vmem:[#allocation5 + $0xd8] sm:$0xff]  ;;  %v725_v10 = vpack.c.bf16 %v209_v2, %v207_v1 }
  0x67   : > { %718 = vmatpush1.bf16.msra.mxu1 %v717_v50  ;;  %v276_v8 = vld [vmem:[#allocation5 + $0x2c8] sm:$0xff]  ;;  %v278_v9 = vld [vmem:[#allocation5 + $0x2d8] sm:$0xff]  ;;  %v789_v11 = vpack.c.bf16 %v273_v5, %v271_v3  ;;  %v727_v12 = vpack.c.bf16 %v214_v7, %v212_v6  ;;  %v211_v13 = vld [vmem:[#allocation5 + $0xc0] sm:$0xff] }
  0x68   : > { %782 = vmatpush1.bf16.msra.mxu0 %v781_v51  ;;  %720 = vmatprep.subr.bf16.mxu1 %v719_v52  ;;  %v213_v14 = vld [vmem:[#allocation5 + $0xd0] sm:$0xff]  ;;  %v275_v15 = vld [vmem:[#allocation5 + $0x2c0] sm:$0xff]  ;;  %v791_v16 = vpack.c.bf16 %v278_v9, %v276_v8  ;;  %v216_v18 = vld [vmem:[#allocation5 + $0xe8] sm:$0xff] }
  0x69   : > { %784 = vmatprep.subr.bf16.mxu0 %v783_v56  ;;  %v277_v17 = vld [vmem:[#allocation5 + $0x2d0] sm:$0xff]  ;;  %v218_v19 = vld [vmem:[#allocation5 + $0xf8] sm:$0xff]  ;;  %v280_v20 = vld [vmem:[#allocation5 + $0x2e8] sm:$0xff]  ;;  %v729_v22 = vpack.c.bf16 %v213_v14, %v211_v13 }
  0x6a   : > { %v282_v21 = vld [vmem:[#allocation5 + $0x2f8] sm:$0xff]  ;;  %v793_v23 = vpack.c.bf16 %v277_v17, %v275_v15  ;;  %v731_v24 = vpack.c.bf16 %v218_v19, %v216_v18  ;;  %v215_v25 = vld [vmem:[#allocation5 + $0xe0] sm:$0xff]  ;;  %v217_v26 = vld [vmem:[#allocation5 + $0xf0] sm:$0xff] }
  0x6b   : > { %722 = vmatpush1.bf16.msra.mxu1 %v721_v62  ;;  %v279_v27 = vld [vmem:[#allocation5 + $0x2e0] sm:$0xff]  ;;  %v795_v28 = vpack.c.bf16 %v282_v21, %v280_v20  ;;  %v281_v29 = vld [vmem:[#allocation5 + $0x2f0] sm:$0xff]  ;;  %v220_v30 = vld [vmem:[#allocation5 + $0x108] sm:$0xff]  ;;  %v733_v34 = vpack.c.bf16 %v217_v26, %v215_v25 }
  0x6c   : > { %786 = vmatpush1.bf16.msra.mxu0 %v785_v63  ;;  %724 = vmatprep.subr.bf16.mxu1 %v723_v0  ;;  %v222_v31 = vld [vmem:[#allocation5 + $0x118] sm:$0xff]  ;;  %v284_v32 = vld [vmem:[#allocation5 + $0x308] sm:$0xff]  ;;  %v797_v35 = vpack.c.bf16 %v281_v29, %v279_v27  ;;  %v219_v37 = vld [vmem:[#allocation5 + $0x100] sm:$0xff] }
  0x6d   : > { %788 = vmatprep.subr.bf16.mxu0 %v787_v4  ;;  %v286_v33 = vld [vmem:[#allocation5 + $0x318] sm:$0xff]  ;;  %v735_v36 = vpack.c.bf16 %v222_v31, %v220_v30  ;;  %v221_v38 = vld [vmem:[#allocation5 + $0x110] sm:$0xff]  ;;  %v283_v39 = vld [vmem:[#allocation5 + $0x300] sm:$0xff] }
  0x6e   : > { %v799_v40 = vpack.c.bf16 %v286_v33, %v284_v32  ;;  %v285_v41 = vld [vmem:[#allocation5 + $0x310] sm:$0xff]  ;;  %v224_v42 = vld [vmem:[#allocation5 + $0x128] sm:$0xff]  ;;  %v226_v43 = vld [vmem:[#allocation5 + $0x138] sm:$0xff]  ;;  %v737_v46 = vpack.c.bf16 %v221_v38, %v219_v37 }
  0x6f   : > { %726 = vmatpush1.bf16.msra.mxu1 %v725_v10  ;;  %v288_v44 = vld [vmem:[#allocation5 + $0x328] sm:$0xff]  ;;  %v290_v45 = vld [vmem:[#allocation5 + $0x338] sm:$0xff]  ;;  %v801_v47 = vpack.c.bf16 %v285_v41, %v283_v39  ;;  %v739_v48 = vpack.c.bf16 %v226_v43, %v224_v42  ;;  %v223_v49 = vld [vmem:[#allocation5 + $0x120] sm:$0xff] }
  0x70   : > { %790 = vmatpush1.bf16.msra.mxu0 %v789_v11  ;;  %728 = vmatprep.subr.bf16.mxu1 %v727_v12  ;;  %v225_v50 = vld [vmem:[#allocation5 + $0x130] sm:$0xff]  ;;  %v287_v51 = vld [vmem:[#allocation5 + $0x320] sm:$0xff]  ;;  %v803_v52 = vpack.c.bf16 %v290_v45, %v288_v44  ;;  %v228_v54 = vld [vmem:[#allocation5 + $0x148] sm:$0xff] }
  0x71   : > { %792 = vmatprep.subr.bf16.mxu0 %v791_v16  ;;  %v289_v53 = vld [vmem:[#allocation5 + $0x330] sm:$0xff]  ;;  %v230_v55 = vld [vmem:[#allocation5 + $0x158] sm:$0xff]  ;;  %v292_v56 = vld [vmem:[#allocation5 + $0x348] sm:$0xff]  ;;  %v741_v58 = vpack.c.bf16 %v225_v50, %v223_v49 }
  0x72   : > { %v294_v57 = vld [vmem:[#allocation5 + $0x358] sm:$0xff]  ;;  %v805_v59 = vpack.c.bf16 %v289_v53, %v287_v51  ;;  %v743_v60 = vpack.c.bf16 %v230_v55, %v228_v54  ;;  %v227_v61 = vld [vmem:[#allocation5 + $0x140] sm:$0xff]  ;;  %v229_v62 = vld [vmem:[#allocation5 + $0x150] sm:$0xff] }
  0x73   : > { %730 = vmatpush1.bf16.msra.mxu1 %v729_v22  ;;  %v291_v63 = vld [vmem:[#allocation5 + $0x340] sm:$0xff]  ;;  %v807_v0 = vpack.c.bf16 %v294_v57, %v292_v56  ;;  %v293_v1 = vld [vmem:[#allocation5 + $0x350] sm:$0xff]  ;;  %v232_v2 = vld [vmem:[#allocation5 + $0x168] sm:$0xff]  ;;  %v745_v6 = vpack.c.bf16 %v229_v62, %v227_v61 }
  0x74   : > { %794 = vmatpush1.bf16.msra.mxu0 %v793_v23  ;;  %732 = vmatprep.subr.bf16.mxu1 %v731_v24  ;;  %v234_v3 = vld [vmem:[#allocation5 + $0x178] sm:$0xff]  ;;  %v296_v4 = vld [vmem:[#allocation5 + $0x368] sm:$0xff]  ;;  %v231_v7 = vld [vmem:[#allocation5 + $0x160] sm:$0xff]  ;;  %v809_v8 = vpack.c.bf16 %v293_v1, %v291_v63 }
  0x75   : > { %796 = vmatprep.subr.bf16.mxu0 %v795_v28  ;;  %v298_v5 = vld [vmem:[#allocation5 + $0x378] sm:$0xff]  ;;  %v747_v9 = vpack.c.bf16 %v234_v3, %v232_v2  ;;  %v233_v10 = vld [vmem:[#allocation5 + $0x170] sm:$0xff]  ;;  %v295_v11 = vld [vmem:[#allocation5 + $0x360] sm:$0xff] }
  0x76   : > { %v297_v12 = vld [vmem:[#allocation5 + $0x370] sm:$0xff]  ;;  %v811_v13 = vpack.c.bf16 %v298_v5, %v296_v4  ;;  %v236_v14 = vld [vmem:[#allocation5 + $0x188] sm:$0xff]  ;;  %v238_v15 = vld [vmem:[#allocation5 + $0x198] sm:$0xff]  ;;  %v749_v20 = vpack.c.bf16 %v233_v10, %v231_v7 }
  0x77   : > { %734 = vmatpush1.bf16.msra.mxu1 %v733_v34  ;;  %v178_v16 = vld [vmem:[%s1244_s3 + $0x8] sm:$0xff]  ;;  %v180_v19 = vld [vmem:[%s1244_s3 + $0x18] sm:$0xff]  ;;  %v813_v21 = vpack.c.bf16 %v297_v12, %v295_v11  ;;  %v751_v22 = vpack.c.bf16 %v238_v15, %v236_v14  ;;  %v235_v23 = vld [vmem:[#allocation5 + $0x180] sm:$0xff] }
  0x78   : > { %798 = vmatpush1.bf16.msra.mxu0 %v797_v35  ;;  %736 = vmatprep.subr.bf16.mxu1 %v735_v36  ;;  %v300_v17 = vld [vmem:[#allocation5 + $0x388] sm:$0xff]  ;;  %v302_v18 = vld [vmem:[#allocation5 + $0x398] sm:$0xff]  ;;  %v237_v24 = vld [vmem:[#allocation5 + $0x190] sm:$0xff] }
  0x79   : > { %800 = vmatprep.subr.bf16.mxu0 %v799_v40  ;;  %417 = vmatprep.mubr.f32.mxu1 %v178_v16  ;;  %v299_v25 = vld [vmem:[#allocation5 + $0x380] sm:$0xff]  ;;  %v815_v26 = vpack.c.bf16 %v302_v18, %v300_v17  ;;  %v301_v27 = vld [vmem:[#allocation5 + $0x390] sm:$0xff]  ;;  %v240_v28 = vld [vmem:[#allocation5 + $0x1a8] sm:$0xff]  ;;  %v753_v32 = vpack.c.bf16 %v237_v24, %v235_v23 }
  0x7a   : > { %494 = vmatprep.mubr.f32.mxu0 %v180_v19  ;;  %v242_v29 = vld [vmem:[#allocation5 + $0x1b8] sm:$0xff]  ;;  %v304_v30 = vld [vmem:[#allocation5 + $0x3a8] sm:$0xff]  ;;  %v817_v33 = vpack.c.bf16 %v301_v27, %v299_v25  ;;  %v239_v35 = vld [vmem:[#allocation5 + $0x1a0] sm:$0xff] }
  0x7b   : > { %738 = vmatpush1.bf16.msra.mxu1 %v737_v46  ;;  %v306_v31 = vld [vmem:[#allocation5 + $0x3b8] sm:$0xff]  ;;  %v755_v34 = vpack.c.bf16 %v242_v29, %v240_v28  ;;  %v241_v36 = vld [vmem:[#allocation5 + $0x1b0] sm:$0xff]  ;;  %v303_v37 = vld [vmem:[#allocation5 + $0x3a0] sm:$0xff] }
  0x7c   : > { %802 = vmatpush1.bf16.msra.mxu0 %v801_v47  ;;  %740 = vmatprep.subr.bf16.mxu1 %v739_v48  ;;  %v819_v38 = vpack.c.bf16 %v306_v31, %v304_v30  ;;  %v305_v39 = vld [vmem:[#allocation5 + $0x3b0] sm:$0xff]  ;;  %v244_v40 = vld [vmem:[#allocation5 + $0x1c8] sm:$0xff]  ;;  %v246_v41 = vld [vmem:[#allocation5 + $0x1d8] sm:$0xff]  ;;  %v757_v44 = vpack.c.bf16 %v241_v36, %v239_v35 }
  0x7d   : > { %804 = vmatprep.subr.bf16.mxu0 %v803_v52  ;;  %v308_v42 = vld [vmem:[#allocation5 + $0x3c8] sm:$0xff]  ;;  %v310_v43 = vld [vmem:[#allocation5 + $0x3d8] sm:$0xff]  ;;  %v821_v45 = vpack.c.bf16 %v305_v39, %v303_v37  ;;  %v759_v46 = vpack.c.bf16 %v246_v41, %v244_v40  ;;  %v243_v47 = vld [vmem:[#allocation5 + $0x1c0] sm:$0xff] }
  0x7e   : > { %v245_v48 = vld [vmem:[#allocation5 + $0x1d0] sm:$0xff]  ;;  %v307_v49 = vld [vmem:[#allocation5 + $0x3c0] sm:$0xff]  ;;  %v823_v50 = vpack.c.bf16 %v310_v43, %v308_v42  ;;  %v248_v52 = vld [vmem:[#allocation5 + $0x1e8] sm:$0xff] }
  0x7f   : > { %742 = vmatpush1.bf16.msra.mxu1 %v741_v58  ;;  %v309_v51 = vld [vmem:[#allocation5 + $0x3d0] sm:$0xff]  ;;  %v250_v53 = vld [vmem:[#allocation5 + $0x1f8] sm:$0xff]  ;;  %v312_v54 = vld [vmem:[#allocation5 + $0x3e8] sm:$0xff]  ;;  %v761_v56 = vpack.c.bf16 %v245_v48, %v243_v47 }
  0x80   : > { %806 = vmatpush1.bf16.msra.mxu0 %v805_v59  ;;  %744 = vmatprep.subr.bf16.mxu1 %v743_v60  ;;  %v314_v55 = vld [vmem:[#allocation5 + $0x3f8] sm:$0xff]  ;;  %v825_v57 = vpack.c.bf16 %v309_v51, %v307_v49  ;;  %v763_v58 = vpack.c.bf16 %v250_v53, %v248_v52  ;;  %v247_v59 = vld [vmem:[#allocation5 + $0x1e0] sm:$0xff]  ;;  %v249_v60 = vld [vmem:[#allocation5 + $0x1f0] sm:$0xff] }
  0x81   : > { %808 = vmatprep.subr.bf16.mxu0 %v807_v0  ;;  %v311_v61 = vld [vmem:[#allocation5 + $0x3e0] sm:$0xff]  ;;  %v827_v62 = vpack.c.bf16 %v314_v55, %v312_v54  ;;  %v313_v63 = vld [vmem:[#allocation5 + $0x3f0] sm:$0xff]  ;;  %v316_v0 = vld [vmem:[#allocation5 + $0x408] sm:$0xff]  ;;  %v765_v2 = vpack.c.bf16 %v249_v60, %v247_v59 }
  0x82   : > { %v318_v1 = vld [vmem:[#allocation5 + $0x418] sm:$0xff]  ;;  %v829_v3 = vpack.c.bf16 %v313_v63, %v311_v61  ;;  %v315_v5 = vld [vmem:[#allocation5 + $0x400] sm:$0xff]  ;;  %v320_v7 = vld [vmem:[#allocation5 + $0x428] sm:$0xff] }
  0x83   : > { %746 = vmatpush1.bf16.msra.mxu1 %v745_v6  ;;  %v831_v4 = vpack.c.bf16 %v318_v1, %v316_v0  ;;  %v317_v6 = vld [vmem:[#allocation5 + $0x410] sm:$0xff]  ;;  %v324_v15 = vld [vmem:[#allocation5 + $0x448] sm:$0xff]  ;;  %v326_v16 = vld [vmem:[#allocation5 + $0x458] sm:$0xff] }
  0x84   : > { %810 = vmatpush1.bf16.msra.mxu0 %v809_v8  ;;  %748 = vmatprep.subr.bf16.mxu1 %v747_v9  ;;  %v322_v8 = vld [vmem:[#allocation5 + $0x438] sm:$0xff]  ;;  %v177_v9 = vld [vmem:[%s1244_s3] sm:$0xff]  ;;  %v833_v10 = vpack.c.bf16 %v317_v6, %v315_v5  ;;  %v179_v11 = vld [vmem:[%s1244_s3 + $0x10] sm:$0xff] }
  0x85   : > { %812 = vmatprep.subr.bf16.mxu0 %v811_v13  ;;  %v835_v12 = vpack.c.bf16 %v322_v8, %v320_v7  ;;  %v319_v13 = vld [vmem:[#allocation5 + $0x420] sm:$0xff]  ;;  %v321_v14 = vld [vmem:[#allocation5 + $0x430] sm:$0xff]  ;;  %v184_v24 = vld [vmem:[%s1244_s3 + $0x38] sm:$0xff] }
  0x86   : > { %v183_v17 = vld [vmem:[%s1244_s3 + $0x30] sm:$0xff]  ;;  %v837_v18 = vpack.c.bf16 %v321_v14, %v319_v13  ;;  %v185_v19 = vld [vmem:[%s1244_s3 + $0x40] sm:$0xff]  ;;  %v328_v25 = vld [vmem:[#allocation5 + $0x468] sm:$0xff] }
  0x87   : > { %750 = vmatpush1.bf16.msra.mxu1 %v749_v20  ;;  %v182_v20 = vld [vmem:[%s1244_s3 + $0x28] sm:$0xff]  ;;  %v325_v23 = vld [vmem:[#allocation5 + $0x450] sm:$0xff]  ;;  %v327_v29 = vld [vmem:[#allocation5 + $0x460] sm:$0xff] }
  0x88   : > { %814 = vmatpush1.bf16.msra.mxu0 %v813_v21  ;;  %752 = vmatprep.subr.bf16.mxu1 %v751_v22  ;;  %v839_v21 = vpack.c.bf16 %v326_v16, %v324_v15  ;;  %v323_v22 = vld [vmem:[#allocation5 + $0x440] sm:$0xff]  ;;  %v329_v30 = vld [vmem:[#allocation5 + $0x470] sm:$0xff]  ;;  %v332_v31 = vld [vmem:[#allocation5 + $0x488] sm:$0xff] }
  0x89   : > { %816 = vmatprep.subr.bf16.mxu0 %v815_v26  ;;  %v330_v26 = vld [vmem:[#allocation5 + $0x478] sm:$0xff]  ;;  %v841_v27 = vpack.c.bf16 %v325_v23, %v323_v22  ;;  %v331_v36 = vld [vmem:[#allocation5 + $0x480] sm:$0xff]  ;;  %v333_v37 = vld [vmem:[#allocation5 + $0x490] sm:$0xff] }
  0x8a   : > { %v843_v28 = vpack.c.bf16 %v330_v26, %v328_v25  ;;  %v338_v39 = vld [vmem:[#allocation5 + $0x4b8] sm:$0x1]  ;;  %v849_v40 = vpack.c.bf16 %v333_v37, %v331_v36  ;;  %v335_v42 = vld [vmem:[#allocation5 + $0x4a0] sm:$0xff]  ;;  %v337_v43 = vld [vmem:[#allocation5 + $0x4b0] sm:$0x1] }
  0x8b   : > { %754 = vmatpush1.bf16.msra.mxu1 %v753_v32  ;;  %v334_v32 = vld [vmem:[#allocation5 + $0x498] sm:$0xff]  ;;  %vm852_vm2 = vmpackc.low %vm346_vm0, %vm1082_vm1 }
  0x8c   : > { %818 = vmatpush1.bf16.msra.mxu0 %v817_v33  ;;  %756 = vmatprep.subr.bf16.mxu1 %v755_v34  ;;  %v1081_v33 = vmov 0.0   ;;  %v845_v34 = vpack.c.bf16 %v329_v30, %v327_v29  ;;  %v847_v35 = vpack.c.bf16 %v334_v32, %v332_v31 }
  0x8d   : > { %820 = vmatprep.subr.bf16.mxu0 %v819_v38  ;;  %v336_v38 = vld [vmem:[#allocation5 + $0x4a8] sm:$0xff] }
  0x8e   : > { %v851_v41 = vpack.c.bf16 %v338_v39, %v336_v38 }
  0x8f   : > { %758 = vmatpush1.bf16.msra.mxu1 %v757_v44  ;;  %v854_v44 = vpack.c.bf16 %v337_v43, %v335_v42 }
  0x90   : > { %822 = vmatpush1.bf16.msra.mxu0 %v821_v45  ;;  %760 = vmatprep.subr.bf16.mxu1 %v759_v46  ;;  %v186_v45 = vld [vmem:[%s1244_s3 + $0x48] sm:$0xff]  ;;  %v181_v46 = vld [vmem:[%s1244_s3 + $0x20] sm:$0xff] }
  0x91   : > { %824 = vmatprep.subr.bf16.mxu0 %v823_v50 }
  0x93   : > { %762 = vmatpush1.bf16.msra.mxu1 %v761_v56 }
  0x94   : > { %826 = vmatpush1.bf16.msra.mxu0 %v825_v57  ;;  %764 = vmatprep.subr.bf16.mxu1 %v763_v58 }
  0x95   : > { %828 = vmatprep.subr.bf16.mxu0 %v827_v62 }
  0x97   : > { %766 = vmatpush1.bf16.msra.mxu1 %v765_v2 }
  0x98   : > { %830 = vmatpush1.bf16.msra.mxu0 %v829_v3  ;;  %857 = vmatprep.subr.bf16.mxu1 %v831_v4 }
  0x99   : > { %832 = vmatprep.subr.bf16.mxu0 %v831_v4 }
  0x9a   : > { %418 = vmatmul.mubr.f32.vlgmr.msra.gmra.mrb[0].mxu1 %v177_v9 }
  0x9b   : > { %495 = vmatmul.mubr.f32.vlgmr.msra.gmra.mrb[0].mxu0 %v179_v11  ;;  %863 = vmatpush1.bf16.msra.mxu1 %v833_v10 }
  0x9c   : > { %834 = vmatpush1.bf16.msra.mxu0 %v833_v10  ;;  %858 = vmatprep.subr.bf16.mxu1 %v835_v12 }
  0x9d   : > { %836 = vmatprep.subr.bf16.mxu0 %v835_v12  ;;  %423 = vmatprep.mubr.f32.mxu1 %v183_v17 }
  0x9e   : > { %500 = vmatprep.mubr.f32.mxu0 %v185_v19  ;;  %424 = vmatmul.mubr.f32.gmra.mrb[2].mxu1 %v182_v20 }
  0x9f   : > { %864 = vmatpush1.bf16.msra.mxu1 %v837_v18  ;;  %501 = vmatmul.mubr.f32.gmra.mrb[2].mxu0 %v184_v24 }
  0xa0   : > { %838 = vmatpush1.bf16.msra.mxu0 %v837_v18  ;;  %859 = vmatprep.subr.bf16.mxu1 %v839_v21 }
  0xa1   : > { %840 = vmatprep.subr.bf16.mxu0 %v839_v21  ;;  %571 = vmatprep.mubr.f32.mxu0 %v1081_v33 }
  0xa2   : > { %577 = vmatprep.mubr.f32.mxu1 %v1081_v33 }
  0xa3   : > { %865 = vmatpush1.bf16.msra.mxu1 %v841_v27 }
  0xa4   : > { %842 = vmatpush1.bf16.msra.mxu0 %v841_v27  ;;  %860 = vmatprep.subr.bf16.mxu1 %v843_v28 }
  0xa5   : > { %844 = vmatprep.subr.bf16.mxu0 %v843_v28 }
  0xa7   : > { %866 = vmatpush1.bf16.msra.mxu1 %v845_v34 }
  0xa8   : > { %846 = vmatpush1.bf16.msra.mxu0 %v845_v34  ;;  %861 = vmatprep.subr.bf16.mxu1 %v847_v35 }
  0xa9   : > { %848 = vmatprep.subr.bf16.mxu0 %v847_v35 }
  0xab   : > { %867 = vmatpush1.bf16.msra.mxu1 %v849_v40 }
  0xac   : > { %850 = vmatpush1.bf16.msra.mxu0 %v849_v40  ;;  %862 = vmatprep.subr.msk.bf16.mxu1 %vm852_vm2, %v851_v41 }
  0xad   : > { %853 = vmatprep.subr.msk.bf16.mxu0 %vm852_vm2, %v851_v41 }
  0xaf   : > { %868 = vmatpush1.bf16.msk.msra.mxu1 %vm852_vm2, %v854_v44 }
  0xb0   : > { %856 = vmatpush1.bf16.msk.msra.mxu0 %vm852_vm2, %v854_v44 }
  0xb2   : > { %696 = vmatmul.mubr.msk.f32.vlgmr.msra.gmra.mrb[4].mxu1 %vm339_vm3, %v186_v45 }
  0xb3   : > { %695 = vmatmul.mubr.msk.f32.vlgmr.msra.gmra.mrb[0].mxu0 %vm339_vm3, %v181_v46 }
 0x16d   : > { %v419_v47 = vpop.f32.mrb[0].mxu1 }
 0x16e   : > { %v421_v48 = vpop.f32.mrb[1].mxu1 }
 0x171   : > { %v425_v49 = vpop.f32.mrb[2].mxu1 }
 0x172   : > { %v502_v50 = vpop.f32.mrb[2].mxu0  ;;  %v427_v51 = vpop.f32.mrb[3].mxu1 }
 0x173   : > { %v503_v52 = vadd.f32 %v502_v50, %v425_v49  ;;  %v504_v53 = vpop.f32.mrb[3].mxu0 }
 0x174   : > { %v505_v54 = vadd.f32 %v504_v53, %v427_v51 }
 0x185   : > { %v579_v55 = vpop.f32.mrb[4].mxu1 }
 0x186   : > { %v573_v56 = vpop.f32.mrb[0].mxu0  ;;  %v580_v57 = vadd.f32 %v579_v55, %v503_v52  ;;  %v581_v58 = vpop.f32.mrb[5].mxu1 }
 0x187   : > { %v869_v59 = vadd.f32 %v573_v56, %v419_v47  ;;  %v575_v60 = vpop.f32.mrb[1].mxu0  ;;  %v582_v61 = vadd.f32 %v581_v58, %v505_v54 }
 0x188   : > { %586 = vst [vmem:[%s176_s17 + $0x10] sm:$0xff] %v580_v57  ;;  %v870_v62 = vadd.f32 %v575_v60, %v421_v48 }
 0x189   : > { %584 = vst [vmem:[%s176_s17] sm:$0xff] %v869_v59  ;;  %587 = vst [vmem:[%s176_s17 + $0x18] sm:$0xff] %v582_v61 }
 0x18a   : > { %585 = vst [vmem:[%s176_s17 + $0x8] sm:$0xff] %v870_v62 }
 0x18b   : > { %1016 = shalt.err (!%p1013_p7)
}
 0x18c   : > { %s1017_s24 = scalar_lea.hbm %s1271_s4, 512  ;;  %s1021_s26 = scalar_lea.hbm %s1317_s2, 1024 }
 0x18d   : > { %p1018_p9 = scmp.ne.s32.totalorder %s1271_s4, %s1017_s24  ;;  %p1022_p5 = scmp.lt.u32.totalorder %s1271_s4, %s1317_s2 }
 0x18e   : > { %p1023_p11 = scmp.lt.u32.totalorder %s1021_s26, %s1017_s24  ;;  %p1025_p4 = scmp.lt.u32.totalorder %s1017_s24, %s1271_s4 }
 0x18f   : > { %p1019_p2 = pnand %p1018_p9, %p1192_p12 }
 0x190   : > { %p1024_p1 = por %p1023_p11, %p1022_p5 }
 0x191   : > { %p1020_p0 = pneg %p1019_p2 }
 0x192   : > { %p1026_p6 = por %p1025_p4, %p1024_p1 }
 0x194   : > { %p1027_p8 = pnand %p1026_p6, %p1020_p0 }
 0x196   : > { %1030 = shalt.err (!%p1027_p8)
}
 0x197   : > { %s1084_s3 = smov 256   ;;  %s1085_s15 = smov 16  }
 0x198   : > { %886 = dma.vmem_to_hbm [thread:$0]  (%p1192_p12), %s1266_s27, 512, %s1271_s4, %s589_s13, %s1084_s3, %s1084_s3, %s1085_s15  }
 0x199 PF: > { %s617_s17 = sand.u32 1, %s1061_s9   ;;  %p1332_p10 = scmp.ne.s32.totalorder %s1322_s16, 0 }
 0x19a   : > { %p1333_p13 = scmp.ge.s32.totalorder %s1073_s12, 2  ;;  %s618_s19 = scalar_lea.sflag [#allocation4], %s617_s17 }
 0x19c   : > { %p897_p3 = pnand %p1333_p13, %p1332_p10 }
 0x19e   : > { %1056 = dma.done.wait (!%p897_p3), %s618_s19, 512  }
 0x19f   : > { %1058 = vsyncadd (!%p897_p3), %s618_s19, 4294966784  ;;  %p16_p7 = scmp.ge.s32.totalorder %s1157_s21, 4   ;;  %s1334_s9 = smov %s1065_s10 }
 0x1a0   : > { %s1335_s10 = smov %s1069_s11  ;;  %s1336_s11 = smov %s1188_s8 }
 0x1a1   : > { %s1337_s12 = smov %s1157_s21  ;;  %18 = sbr.rel (!%p16_p7) target bundleno = 6 (0x6), region = 77 }
 0x1a8   :  { %623 = vsyncpa [#allocation3], 1 }
 0x1a9   :  { %625 = vsyncpa [#allocation3 + $0x1], 1 }
 0x1aa   :  { %626 = vsyncpa [#allocation6], 1 }
 0x1ab   :  { %627 = vsyncpa [#allocation4], 1 }
 0x1ac   :  { %629 = vsyncpa [#allocation4 + $0x1], 1 }

</bundles_post_ra>
